<compile_context>
chip_gen: v7x
topology: tpu7x:2x2x1
jax: 0.10.0
libtpu: 0.0.40
codegen_flags: <defaults>
</compile_context>

<pallas_src>
import jax
import jax.numpy as jnp
from jax.experimental import pallas as pl
from jax.experimental.pallas import tpu as pltpu

MASK_EPS = 1e-30  # TPU-safe stand-in for masked_log_softmax's 1e-45 (subnormal on TPU)


# --------------------------------------------------------------------------- #
# Kernel
# --------------------------------------------------------------------------- #
def pointer_kernel(enc_ref, dproj_ref, logmask_ref, w1t_ref, v_ref, out_ref):
    """One batch tile of the pointer forward pass.

    enc_ref:     (Bt, N, D)  encoder states          (bf16 or f32)
    dproj_ref:   (Bt, D)     decoder_state @ W2^T    (f32, precomputed on host)
    logmask_ref: (Bt, N)     log(mask + eps)         (f32, precomputed on host)
    w1t_ref:     (D, D)      W1^T                    (same dtype as enc)
    v_ref:       (1, D)      v / temperature         (f32)
    out_ref:     (Bt, N)     masked log-softmax      (f32)
    """
    Bt, N, D = enc_ref.shape

    # Encoder projection on a tall (Bt*N, D) operand -> good MXU M-occupancy.
    # (Leading-dim merge/split reshapes keep the lane dim D and are layout no-ops.)
    enc_flat = enc_ref[...].reshape(Bt * N, D)
    h = jnp.dot(enc_flat, w1t_ref[...], preferred_element_type=jnp.float32)
    h = h.reshape(Bt, N, D)

    # Post-matmul elementwise math stays f32 (v5e has no bf16 VPU/EUP path).
    t = jnp.tanh(h + dproj_ref[...][:, None, :])               # (Bt, N, D)

    # v-projection as VPU multiply + lane reduce (avoids a width-1 MXU output).
    u = jnp.sum(t * v_ref[...], axis=-1)                       # (Bt, N), seq on lanes

    # Masked log-softmax along the sequence (lane) axis.
    u = u + logmask_ref[...]
    m = jnp.max(u, axis=-1, keepdims=True)                     # (Bt, 1)
    z = u - m
    lse = jnp.log(jnp.sum(jnp.exp(z), axis=-1, keepdims=True))
    out_ref[...] = (z - lse).astype(out_ref.dtype)


# --------------------------------------------------------------------------- #
# Tiling / VMEM heuristics
# --------------------------------------------------------------------------- #
def _vmem_capacity_bytes():
    try:
        return int(pltpu.get_tpu_info().vmem_capacity_bytes)
    except Exception:
        return 64 << 20  # conservative fallback (v7x per-TensorCore VMEM)


def _block_vmem_bytes(bt, N, D, enc_bytes, single_buffer_weights=True):
    """Per-grid-step VMEM working set for a batch tile of `bt` rows."""
    enc_block = 2 * bt * N * D * enc_bytes          # double-buffered encoded input
    dproj_block = 2 * bt * D * 4                    # double-buffered decoder proj
    mask_block = 2 * bt * N * 4                     # double-buffered log-mask
    out_block = 2 * bt * N * 4                      # double-buffered output
    weights = (1 if single_buffer_weights else 2) * D * D * enc_bytes + 2 * D * 4
    intermediates = 2 * bt * N * D * 4              # f32 h + tanh/t temporaries
    return enc_block + dproj_block + mask_block + out_block + weights + intermediates


def _choose_block_b(B, N, D, enc_bytes, vmem_capacity):
    """Largest batch tile whose working set fits a generation-aware budget.

    * budget = 3/8 of physical VMEM (~48 MiB on 128 MiB v5e/v6e, ~24 MiB on v7x).
    * keep grid_b >= 2 whenever B allows, so the "parallel" batch axis can be
      sharded across both v7x TensorCores (an extra ~0.35 us step elsewhere).
    * candidate tiles are multiple-of-8 divisors of B (sublane alignment);
      batches with no such divisor fall back to one whole-batch block.
    """
    budget = (vmem_capacity * 3) // 8
    divisors = [bt for bt in range(8, B + 1, 8) if B % bt == 0]
    if not divisors:
        divisors = [B]
    preferred = [bt for bt in divisors if B // bt >= 2] or divisors
    fitting = [bt for bt in preferred
               if _block_vmem_bytes(bt, N, D, enc_bytes) <= budget]
    if fitting:
        return max(fitting)
    return min(divisors)


# --------------------------------------------------------------------------- #
# Wrapper
# --------------------------------------------------------------------------- #
def _pallas_forward(enc, dproj, log_mask, w1t, v_scaled, block_b,
                    vmem_limit_bytes, single_buffer_weights):
    B, N, D = enc.shape
    grid_b = B // block_b

    weight_kwargs = {}
    if single_buffer_weights:
        # Grid-invariant operands (constant index_map): fetched once, no need
        # for a second pipeline buffer.
        weight_kwargs = dict(pipeline_mode=pl.Buffered(1))

    return pl.pallas_call(
        pointer_kernel,
        out_shape=jax.ShapeDtypeStruct((B, N), jnp.float32),
        grid=(grid_b,),
        in_specs=[
            pl.BlockSpec((block_b, N, D), lambda b: (b, 0, 0)),        # encoded
            pl.BlockSpec((block_b, D), lambda b: (b, 0)),              # decoder proj
            pl.BlockSpec((block_b, N), lambda b: (b, 0)),              # log-mask
            pl.BlockSpec((D, D), lambda b: (0, 0), **weight_kwargs),   # W1^T
            pl.BlockSpec((1, D), lambda b: (0, 0), **weight_kwargs),   # v / T
        ],
        out_specs=pl.BlockSpec((block_b, N), lambda b: (b, 0)),
        compiler_params=pltpu.CompilerParams(
            dimension_semantics=("parallel",),
            vmem_limit_bytes=vmem_limit_bytes),
    )(enc, dproj, log_mask, w1t, v_scaled)


def pointer_forward(encoded, decoder_state, w1, w2, v, mask=None, temperature=1.0,
                    block_b=None, compute_dtype=jnp.bfloat16):
    """Pallas implementation of PointerLayer.forward (PointerStandard logits).

    `compute_dtype` is the dtype of the HBM-resident encoder tensor and of W1^T
    as fed to the MXU (bf16 by default); accumulation and all elementwise /
    softmax math stay f32.
    """
    B, N, D = encoded.shape
    if mask is None:
        mask = jnp.ones((B, N), dtype=jnp.float32)

    enc_bytes = jnp.dtype(compute_dtype).itemsize
    vmem_capacity = _vmem_capacity_bytes()
    if block_b is None:
        block_b = _choose_block_b(B, N, D, enc_bytes, vmem_capacity)
    assert B % block_b == 0, "block_b must divide the batch size"
    assert block_b == B or block_b % 8 == 0, (
        "block_b must be a multiple of 8 (sublane alignment) or the whole batch")

    # Explicit scoped-VMEM limit sized to the chosen tile (the defaults —
    # 16 MiB on v5e, 32 MiB on v6e/v7x — do not match the real working set).
    need = _block_vmem_bytes(block_b, N, D, enc_bytes)
    vmem_limit_bytes = int(min(vmem_capacity * 9 // 10,
                               max(need * 3 // 2, 32 << 20)))

    # Host-side, once per call (never per grid step):
    #  * MXU operands cast to compute_dtype (bf16 halves encoded's HBM traffic).
    #  * decoder projection hoisted to one well-shaped (B,D)x(D,D) XLA matmul.
    #  * 1/temperature folded into v; TPU-safe log-mask precomputed.
    enc = encoded.astype(compute_dtype)
    w1t = w1.T.astype(compute_dtype)
    dproj = decoder_state.astype(jnp.float32) @ w2.T.astype(jnp.float32)   # (B, D)
    v_scaled = v.reshape(1, D).astype(jnp.float32) / jnp.float32(temperature)
    log_mask = jnp.log(mask.astype(jnp.float32) + MASK_EPS)

    try:
        return _pallas_forward(enc, dproj, log_mask, w1t, v_scaled, block_b,
                               vmem_limit_bytes, single_buffer_weights=True)
    except Exception:
        # Fallback for environments whose BlockSpec / pipeline lowering does not
        # accept pipeline_mode=pl.Buffered(1); only costs one extra weight buffer.
        return _pallas_forward(enc, dproj, log_mask, w1t, v_scaled, block_b,
                               vmem_limit_bytes, single_buffer_weights=False)


# --------------------------------------------------------------------------- #
# Reference + self-test
# --------------------------------------------------------------------------- #
def reference_forward(encoded, decoder_state, w1, w2, v, mask, temperature):
    """Plain-JAX reference mirroring the PyTorch semantics (same mask epsilon)."""
    h = encoded @ w1.T + (decoder_state @ w2.T)[:, None, :]
    u = (jnp.tanh(h) @ v.T)[..., 0]          # (B, N)
    u = u / temperature
    u = u + jnp.log(mask + MASK_EPS)
    return jax.nn.log_softmax(u, axis=1)


def _run_case(key, B, N, D, temperature, compute_dtype, atol, rtol, block_b=None):
    k_enc, k_dec, k_w1, k_w2, k_v = jax.random.split(key, 5)
    encoded = jax.random.normal(k_enc, (B, N, D), dtype=jnp.float32)
    decoder_state = jax.random.normal(k_dec, (B, D), dtype=jnp.float32)
    # PyTorch Linear(D, D, bias=False) weight convention: (out_features, in_features)
    w1 = jax.random.normal(k_w1, (D, D), dtype=jnp.float32) * (1.0 / jnp.sqrt(D))
    w2 = jax.random.normal(k_w2, (D, D), dtype=jnp.float32) * (1.0 / jnp.sqrt(D))
    v = jax.random.normal(k_v, (1, D), dtype=jnp.float32) * (1.0 / jnp.sqrt(D))

    # Mask out the last two positions of even batch rows; odd rows fully valid.
    mask = jnp.ones((B, N), dtype=jnp.float32)
    mask = mask.at[::2, -2:].set(0.0)

    out = pointer_forward(encoded, decoder_state, w1, w2, v, mask=mask,
                          temperature=temperature, block_b=block_b,
                          compute_dtype=compute_dtype)
    out = jax.block_until_ready(out)
    ref = reference_forward(encoded, decoder_state, w1, w2, v, mask, temperature)

    assert out.shape == (B, N)
    assert bool(jnp.all(jnp.isfinite(out)))
    assert jnp.allclose(out, ref, atol=atol, rtol=rtol), (
        f"mismatch vs reference at B={B} N={N} D={D} dtype={compute_dtype}")


if __name__ == "__main__":
    key = jax.random.PRNGKey(0)
    k1, k2 = jax.random.split(key)

    # Small shapes implied by the module: batch=2, seq=8, embedding_dim=32.
    # f32 compute path -> tight check of the kernel math (whole batch, grid=(1,)).
    _run_case(k1, B=2, N=8, D=32, temperature=1.5,
              compute_dtype=jnp.float32, atol=1e-4, rtol=1e-5)

    # bf16 MXU path (production configuration), exercising the batch tiling:
    # auto block_b=8 -> grid of 2 "parallel" steps.
    _run_case(k2, B=16, N=16, D=128, temperature=2.0,
              compute_dtype=jnp.bfloat16, atol=5e-2, rtol=5e-2)

    print("KERNEL_OK")
</pallas_src>

<mosaic_0001>
module attributes {stable_mosaic.version = 11 : i64} {
  func.func @pointer_kernel(%arg0: i32, %arg1: memref<2x8x32xf32, #tpu.memory_space<vmem>>, %arg2: memref<2x32xf32, #tpu.memory_space<vmem>>, %arg3: memref<2x8xf32, #tpu.memory_space<vmem>>, %arg4: memref<32x32xf32, #tpu.memory_space<vmem>>, %arg5: memref<1x32xf32, #tpu.memory_space<vmem>>, %arg6: memref<2x8xf32, #tpu.memory_space<vmem>>) attributes {dimension_semantics = [#tpu.dimension_semantics<parallel>], iteration_bounds = array<i64: 1>, scalar_prefetch = 0 : i64, scratch_operands = 0 : i64, tpu.core_type = #tpu.core_type<tc>, window_params = [{transform_indices = @transform_0, window_bounds = array<i64: 2, 8, 32>}, {transform_indices = @transform_1, window_bounds = array<i64: 2, 32>}, {transform_indices = @transform_2, window_bounds = array<i64: 2, 8>}, {pipeline_mode = #tpu.pipeline_mode<synchronous>, transform_indices = @transform_3, window_bounds = array<i64: 32, 32>}, {pipeline_mode = #tpu.pipeline_mode<synchronous>, transform_indices = @transform_4, window_bounds = array<i64: 1, 32>}, {transform_indices = @transform_5, window_bounds = array<i64: 2, 8>}]} {
    %c0 = arith.constant 0 : index
    %c0_0 = arith.constant 0 : index
    %c0_1 = arith.constant 0 : index
    %0 = vector.load %arg1[%c0, %c0_0, %c0_1] : memref<2x8x32xf32, #tpu.memory_space<vmem>>, vector<2x8x32xf32>
    %1 = vector.shape_cast %0 : vector<2x8x32xf32> to vector<16x32xf32>
    %c0_2 = arith.constant 0 : index
    %c0_3 = arith.constant 0 : index
    %2 = vector.load %arg4[%c0_2, %c0_3] : memref<32x32xf32, #tpu.memory_space<vmem>>, vector<32x32xf32>
    %cst = arith.constant dense<0.000000e+00> : vector<16x32xf32>
    %3 = tpu.matmul %1, %2, %cst {dimension_numbers = #tpu.dot_dimension_numbers<[1], [0], [0], [1], [0, 0, 1, 1], [], []>} : vector<16x32xf32>, vector<32x32xf32>, vector<16x32xf32> -> vector<16x32xf32>
    %4 = vector.shape_cast %3 : vector<16x32xf32> to vector<2x8x32xf32>
    %c0_4 = arith.constant 0 : index
    %c0_5 = arith.constant 0 : index
    %5 = vector.load %arg2[%c0_4, %c0_5] : memref<2x32xf32, #tpu.memory_space<vmem>>, vector<2x32xf32>
    %6 = vector.shape_cast %5 : vector<2x32xf32> to vector<2x1x32xf32>
    %7 = vector.broadcast %6 : vector<2x1x32xf32> to vector<2x8x32xf32>
    %8 = arith.addf %4, %7 : vector<2x8x32xf32>
    %9 = math.tanh %8 : vector<2x8x32xf32>
    %c0_6 = arith.constant 0 : index
    %c0_7 = arith.constant 0 : index
    %10 = vector.load %arg5[%c0_6, %c0_7] : memref<1x32xf32, #tpu.memory_space<vmem>>, vector<1x32xf32>
    %11 = vector.shape_cast %10 : vector<1x32xf32> to vector<1x1x32xf32>
    %12 = vector.broadcast %11 : vector<1x1x32xf32> to vector<2x8x32xf32>
    %13 = arith.mulf %9, %12 : vector<2x8x32xf32>
    %cst_8 = arith.constant dense<0.000000e+00> : vector<2x8xf32>
    %14 = vector.multi_reduction <add>, %13, %cst_8 [2] : vector<2x8x32xf32> to vector<2x8xf32>
    %c0_9 = arith.constant 0 : index
    %c0_10 = arith.constant 0 : index
    %15 = vector.load %arg3[%c0_9, %c0_10] : memref<2x8xf32, #tpu.memory_space<vmem>>, vector<2x8xf32>
    %16 = arith.addf %14, %15 : vector<2x8xf32>
    %cst_11 = arith.constant dense<0xFF800000> : vector<2xf32>
    %17 = vector.multi_reduction <maximumf>, %16, %cst_11 [1] : vector<2x8xf32> to vector<2xf32>
    %18 = vector.shape_cast %17 : vector<2xf32> to vector<2x1xf32>
    %19 = vector.broadcast %18 : vector<2x1xf32> to vector<2x8xf32>
    %20 = arith.subf %16, %19 : vector<2x8xf32>
    %21 = math.exp %20 : vector<2x8xf32>
    %cst_12 = arith.constant dense<0.000000e+00> : vector<2xf32>
    %22 = vector.multi_reduction <add>, %21, %cst_12 [1] : vector<2x8xf32> to vector<2xf32>
    %23 = vector.shape_cast %22 : vector<2xf32> to vector<2x1xf32>
    %24 = math.log %23 : vector<2x1xf32>
    %25 = vector.broadcast %24 : vector<2x1xf32> to vector<2x8xf32>
    %26 = arith.subf %20, %25 : vector<2x8xf32>
    %c0_13 = arith.constant 0 : index
    %c0_14 = arith.constant 0 : index
    %27 = vector.load %arg6[%c0_13, %c0_14] : memref<2x8xf32, #tpu.memory_space<vmem>>, vector<2x8xf32>
    tpu.vector_store %arg6[%c0_13, %c0_14], %26 {strides = array<i32>} : memref<2x8xf32, #tpu.memory_space<vmem>>, vector<2x8xf32>,
    return
  }
  func.func @transform_0(%arg0: i32) -> (i32, i32, i32) {
    %c0_i32 = arith.constant 0 : i32
    %c0_i32_0 = arith.constant 0 : i32
    %c0_i32_1 = arith.constant 0 : i32
    return %arg0, %c0_i32, %c0_i32_0 : i32, i32, i32
  }
  func.func @transform_1(%arg0: i32) -> (i32, i32) {
    %c0_i32 = arith.constant 0 : i32
    %c0_i32_0 = arith.constant 0 : i32
    return %arg0, %c0_i32 : i32, i32
  }
  func.func @transform_2(%arg0: i32) -> (i32, i32) {
    %c0_i32 = arith.constant 0 : i32
    %c0_i32_0 = arith.constant 0 : i32
    return %arg0, %c0_i32 : i32, i32
  }
  func.func @transform_3(%arg0: i32) -> (i32, i32) {
    %c0_i32 = arith.constant 0 : i32
    %c0_i32_0 = arith.constant 0 : i32
    %c0_i32_1 = arith.constant 0 : i32
    return %c0_i32, %c0_i32_0 : i32, i32
  }
  func.func @transform_4(%arg0: i32) -> (i32, i32) {
    %c0_i32 = arith.constant 0 : i32
    %c0_i32_0 = arith.constant 0 : i32
    %c0_i32_1 = arith.constant 0 : i32
    return %c0_i32, %c0_i32_0 : i32, i32
  }
  func.func @transform_5(%arg0: i32) -> (i32, i32) {
    %c0_i32 = arith.constant 0 : i32
    %c0_i32_0 = arith.constant 0 : i32
    return %arg0, %c0_i32 : i32, i32
  }
}

module attributes {stable_mosaic.version = 11 : i64} {
  func.func @pointer_kernel(%arg0: i32, %arg1: memref<2x8x32xf32, #tpu.memory_space<vmem>>, %arg2: memref<2x32xf32, #tpu.memory_space<vmem>>, %arg3: memref<2x8xf32, #tpu.memory_space<vmem>>, %arg4: memref<32x32xf32, #tpu.memory_space<vmem>>, %arg5: memref<1x32xf32, #tpu.memory_space<vmem>>, %arg6: memref<2x8xf32, #tpu.memory_space<vmem>>) attributes {dimension_semantics = [#tpu.dimension_semantics<parallel>], iteration_bounds = array<i64: 1>, scalar_prefetch = 0 : i64, scratch_operands = 0 : i64, tpu.core_type = #tpu.core_type<tc>, window_params = [{transform_indices = @transform_0, window_bounds = array<i64: 2, 8, 32>}, {transform_indices = @transform_1, window_bounds = array<i64: 2, 32>}, {transform_indices = @transform_2, window_bounds = array<i64: 2, 8>}, {pipeline_mode = #tpu.pipeline_mode<synchronous>, transform_indices = @transform_3, window_bounds = array<i64: 32, 32>}, {pipeline_mode = #tpu.pipeline_mode<synchronous>, transform_indices = @transform_4, window_bounds = array<i64: 1, 32>}, {transform_indices = @transform_5, window_bounds = array<i64: 2, 8>}]} {
    %c0 = arith.constant 0 : index
    %c0_0 = arith.constant 0 : index
    %c0_1 = arith.constant 0 : index
    %0 = vector.load %arg1[%c0, %c0_0, %c0_1] : memref<2x8x32xf32, #tpu.memory_space<vmem>>, vector<2x8x32xf32>
    %1 = vector.shape_cast %0 : vector<2x8x32xf32> to vector<16x32xf32>
    %c0_2 = arith.constant 0 : index
    %c0_3 = arith.constant 0 : index
    %2 = vector.load %arg4[%c0_2, %c0_3] : memref<32x32xf32, #tpu.memory_space<vmem>>, vector<32x32xf32>
    %cst = arith.constant dense<0.000000e+00> : vector<16x32xf32>
    %3 = tpu.matmul %1, %2, %cst {dimension_numbers = #tpu.dot_dimension_numbers<[1], [0], [0], [1], [0, 0, 1, 1], [], []>} : vector<16x32xf32>, vector<32x32xf32>, vector<16x32xf32> -> vector<16x32xf32>
    %4 = vector.shape_cast %3 : vector<16x32xf32> to vector<2x8x32xf32>
    %c0_4 = arith.constant 0 : index
    %c0_5 = arith.constant 0 : index
    %5 = vector.load %arg2[%c0_4, %c0_5] : memref<2x32xf32, #tpu.memory_space<vmem>>, vector<2x32xf32>
    %6 = vector.shape_cast %5 : vector<2x32xf32> to vector<2x1x32xf32>
    %7 = vector.broadcast %6 : vector<2x1x32xf32> to vector<2x8x32xf32>
    %8 = arith.addf %4, %7 : vector<2x8x32xf32>
    %9 = math.tanh %8 : vector<2x8x32xf32>
    %c0_6 = arith.constant 0 : index
    %c0_7 = arith.constant 0 : index
    %10 = vector.load %arg5[%c0_6, %c0_7] : memref<1x32xf32, #tpu.memory_space<vmem>>, vector<1x32xf32>
    %11 = vector.shape_cast %10 : vector<1x32xf32> to vector<1x1x32xf32>
    %12 = vector.broadcast %11 : vector<1x1x32xf32> to vector<2x8x32xf32>
    %13 = arith.mulf %9, %12 : vector<2x8x32xf32>
    %cst_8 = arith.constant dense<0.000000e+00> : vector<2x8xf32>
    %14 = vector.multi_reduction <add>, %13, %cst_8 [2] : vector<2x8x32xf32> to vector<2x8xf32>
    %c0_9 = arith.constant 0 : index
    %c0_10 = arith.constant 0 : index
    %15 = vector.load %arg3[%c0_9, %c0_10] : memref<2x8xf32, #tpu.memory_space<vmem>>, vector<2x8xf32>
    %16 = arith.addf %14, %15 : vector<2x8xf32>
    %cst_11 = arith.constant dense<0xFF800000> : vector<2xf32>
    %17 = vector.multi_reduction <maximumf>, %16, %cst_11 [1] : vector<2x8xf32> to vector<2xf32>
    %18 = vector.shape_cast %17 : vector<2xf32> to vector<2x1xf32>
    %19 = vector.broadcast %18 : vector<2x1xf32> to vector<2x8xf32>
    %20 = arith.subf %16, %19 : vector<2x8xf32>
    %21 = math.exp %20 : vector<2x8xf32>
    %cst_12 = arith.constant dense<0.000000e+00> : vector<2xf32>
    %22 = vector.multi_reduction <add>, %21, %cst_12 [1] : vector<2x8xf32> to vector<2xf32>
    %23 = vector.shape_cast %22 : vector<2xf32> to vector<2x1xf32>
    %24 = math.log %23 : vector<2x1xf32>
    %25 = vector.broadcast %24 : vector<2x1xf32> to vector<2x8xf32>
    %26 = arith.subf %20, %25 : vector<2x8xf32>
    %c0_13 = arith.constant 0 : index
    %c0_14 = arith.constant 0 : index
    %27 = vector.load %arg6[%c0_13, %c0_14] : memref<2x8xf32, #tpu.memory_space<vmem>>, vector<2x8xf32>
    tpu.vector_store %arg6[%c0_13, %c0_14], %26 {strides = array<i32>} : memref<2x8xf32, #tpu.memory_space<vmem>>, vector<2x8xf32>,
    return
  }
  func.func @transform_0(%arg0: i32) -> (i32, i32, i32) {
    %c0_i32 = arith.constant 0 : i32
    %c0_i32_0 = arith.constant 0 : i32
    %c0_i32_1 = arith.constant 0 : i32
    return %arg0, %c0_i32, %c0_i32_0 : i32, i32, i32
  }
  func.func @transform_1(%arg0: i32) -> (i32, i32) {
    %c0_i32 = arith.constant 0 : i32
    %c0_i32_0 = arith.constant 0 : i32
    return %arg0, %c0_i32 : i32, i32
  }
  func.func @transform_2(%arg0: i32) -> (i32, i32) {
    %c0_i32 = arith.constant 0 : i32
    %c0_i32_0 = arith.constant 0 : i32
    return %arg0, %c0_i32 : i32, i32
  }
  func.func @transform_3(%arg0: i32) -> (i32, i32) {
    %c0_i32 = arith.constant 0 : i32
    %c0_i32_0 = arith.constant 0 : i32
    %c0_i32_1 = arith.constant 0 : i32
    return %c0_i32, %c0_i32_0 : i32, i32
  }
  func.func @transform_4(%arg0: i32) -> (i32, i32) {
    %c0_i32 = arith.constant 0 : i32
    %c0_i32_0 = arith.constant 0 : i32
    %c0_i32_1 = arith.constant 0 : i32
    return %c0_i32, %c0_i32_0 : i32, i32
  }
  func.func @transform_5(%arg0: i32) -> (i32, i32) {
    %c0_i32 = arith.constant 0 : i32
    %c0_i32_0 = arith.constant 0 : i32
    return %arg0, %c0_i32 : i32, i32
  }
}

</mosaic_0001>

<bundles_post_ra>
// kernel: tpu_custom_call.1
= control target key start
LH: loop header
LB: loop body
LE: loop exit
PB: predicated region body
PF: predicated region fallthrough
CT: control target
= control target key end

     0   :  { %10 = vsyncpa [#allocation3], 0  ;;  %s547_s0 = inlined_call_operand.hbm [shape: f32[2,8,32], index: 0, kind: input, shape index: {}]   ;;  %s548_s1 = inlined_call_operand.vmem [shape: f32[2,32], index: 1, kind: input, shape index: {}]   ;;  %s549_s2 = inlined_call_operand.vmem [shape: f32[2,8], index: 2, kind: input, shape index: {}]   ;;  %s550_s3 = inlined_call_operand.hbm [shape: f32[32,32], index: 3, kind: input, shape index: {}]   ;;  %s551_s4 = inlined_call_operand.vmem [shape: f32[1,32], index: 4, kind: input, shape index: {}]   ;;  %s552_s5 = inlined_call_operand.hbm [shape: f32[2,8], index: 5, kind: output, shape index: {}]  }
   0x1   :  { %11 = vsyncpa [#allocation6], 0 }
   0x2   :  { %12 = vsyncpa [#allocation4], 0  ;;  %s443_s18 = smov [#allocation2]   ;;  %s371_s22 = scalar_lea.hbm %s547_s0, 256 }
   0x3   :  { %s18_s19 = sshll.u32 %s443_s18, 4  ;;  %p372_p0 = scmp.ne.s32.totalorder %s547_s0, %s371_s22  ;;  %s19_s19 = int_to_ptr.vmem [resolvable:$true] %s18_s19 }
   0x4   :  { %p375_p1 = scmp.lt.u32.totalorder %s371_s22, %s547_s0 }
   0x6   :  { %p377_p2 = pnand %p375_p1, %p372_p0 }
   0x8   :  { %380 = shalt.err (!%p377_p2)
}
   0x9   :  { %s381_s27 = scalar_lea.vmem %s19_s19, 256  ;;  %p386_p4 = scmp.lt.s32.totalorder %s19_s19, %s19_s19 }
   0xa   :  { %p382_p3 = scmp.ne.s32.totalorder %s19_s19, %s381_s27  ;;  %p387_p5 = scmp.lt.s32.totalorder %s381_s27, %s381_s27 }
   0xc   :  { %p388_p6 = por %p387_p5, %p386_p4 }
   0xe   :  { %p389_p7 = pnand %p388_p6, %p382_p3 }
  0x10   :  { %392 = shalt.err (!%p389_p7)
}
  0x11   :  { %s444_s28 = smov 128   ;;  %s445_s29 = smov 8  }
  0x12   :  { %24 = dma.hbm_to_vmem [thread:$0]  %s547_s0, 256, %s19_s19, [#allocation3], %s444_s28, %s444_s28, %s445_s29  }
  0x13   :  { %s446_s7 = smov [#allocation5]   ;;  %s393_s11 = scalar_lea.hbm %s550_s3, 512 }
  0x14   :  { %s34_s8 = sshll.u32 %s446_s7, 4  ;;  %p394_p8 = scmp.ne.s32.totalorder %s550_s3, %s393_s11  ;;  %s35_s8 = int_to_ptr.vmem [resolvable:$true] %s34_s8 }
  0x15   :  { %p397_p9 = scmp.lt.u32.totalorder %s393_s11, %s550_s3 }
  0x17   :  { %p399_p10 = pnand %p397_p9, %p394_p8 }
  0x19   :  { %402 = shalt.err (!%p399_p10)
}
  0x1a   :  { %s403_s16 = scalar_lea.vmem %s35_s8, 512  ;;  %p408_p12 = scmp.lt.s32.totalorder %s35_s8, %s35_s8 }
  0x1b   :  { %p404_p11 = scmp.ne.s32.totalorder %s35_s8, %s403_s16  ;;  %p409_p13 = scmp.lt.s32.totalorder %s403_s16, %s403_s16 }
  0x1d   :  { %p410_p0 = por %p409_p13, %p408_p12 }
  0x1f   :  { %p411_p1 = pnand %p410_p0, %p404_p11 }
  0x21   :  { %414 = shalt.err (!%p411_p1)
}
  0x22   :  { %40 = dma.hbm_to_vmem [thread:$0]  %s550_s3, 512, %s35_s8, [#allocation6], %s444_s28, %s444_s28, %s445_s29  }
  0x23   :  { %437 = dma.done.wait [#allocation3], 256  }
  0x24   :  { %438 = vsyncadd [#allocation3], 4294967040 }
  0x25   :  { %439 = dma.done.wait [#allocation6], 512  }
  0x26   :  { %440 = vsyncadd [#allocation6], 4294966784  ;;  %vm55_vm0 = vcmask 261120   ;;  %v51_v0 = vld [vmem:[#allocation5] sm:$0xff]  ;;  %v52_v1 = vld [vmem:[#allocation5 + $0x8] sm:$0xff]  ;;  %v150_v8 = vlaneseq  ;;  %v448_v36 = vmov 0  }
  0x27   :  { %v53_v2 = vld [vmem:[#allocation5 + $0x10] sm:$0xff]  ;;  %v344_v3 = vpack.c.bf16 %v52_v1, %v51_v0  ;;  %v54_v4 = vld [vmem:[#allocation5 + $0x18] sm:$0xff]  ;;  %v447_v15 = vmov 1966171168   ;;  %359 = vset.pattern.permute.xlu0 %v448_v36  ;;  %360 = vset.pattern.permute.xlu1 %v448_v36  ;;  %vm228_vm1 = vcmask 1041409   ;;  %vm231_vm2 = vcmask 58368  }
  0x28   :  { %v49_v5 = vld [vmem:[#allocation2] sm:$0xff]  ;;  %v348_v6 = vpack.c.bf16 %v54_v4, %v53_v2  ;;  %v50_v7 = vld [vmem:[#allocation2 + $0x8] sm:$0xff]  ;;  %v151_v9 = vshrl.u32 %v150_v8, 7  ;;  %v148_v16 = vunpack.c.l.s4 %v447_v15  ;;  %v219_v43 = vand.u32 127, %v150_v8 }
  0x29   :  { %341 = vmatprep.mubr.msk.f32.mxu0 %vm55_vm0, %v49_v5  ;;  %345 = vmatprep.subr.bf16.mxu0 %v344_v3  ;;  %v190_v11 = vld [vmem:[%s549_s2] sm:$0x3] }
  0x2a   :  { %347 = vmatpush3.bf16.msra.mxu0 %v344_v3  ;;  %v506_v10 = vsub.s32 0, %v151_v9  ;;  %v511_v12 = vsub.s32 1, %v151_v9  ;;  %v149_v17 = vunpack.c.0.s8 %v148_v16  ;;  %v325_v18 = vld.sshfl [vmem:[%s548_s1] sm:$0x11 pattern:$0x75316420]  ;;  %v222_v44 = vsub.s32 %v219_v43, %v151_v9 }
  0x2b   :  { %349 = vmatprep.subr.bf16.mxu0 %v348_v6  ;;  %v146_v19 = vcombine.high %v325_v18, %v325_v18  ;;  %v326_v29 = vld [vmem:[%s551_s4] ss:$0 sm:$0xff]  ;;  %s449_s1 = smov [#allocation7]  }
  0x2c   :  { %v195_v13 = vrot.slane %v190_v11, %v506_v10  ;;  %v202_v14 = vrot.slane %v190_v11, %v511_v12  ;;  %v152_v20 = vsub.s32 %v149_v17, %v151_v9  ;;  %s313_s4 = sshll.u32 %s449_s1, 4  ;;  %s314_s4 = int_to_ptr.vmem [resolvable:$true] %s313_s4 }
  0x2d   :  { %s415_s22 = scalar_lea.vmem %s314_s4, 32  ;;  %p420_p3 = scmp.lt.s32.totalorder %s314_s4, %s314_s4 }
  0x2e   :  { %351 = vmatpush3.bf16.msra.mxu0 %v348_v6  ;;  %197 = vbcast.lane.b32.xlu1 %v195_v13, 256  ;;  %v160_v21 = vrot.slane %v146_v19, %v152_v20  ;;  %v153_v22 = vrot.slane %v325_v18, %v152_v20  ;;  %p416_p2 = scmp.ne.s32.totalorder %s314_s4, %s415_s22  ;;  %p421_p4 = scmp.lt.s32.totalorder %s415_s22, %s415_s22 }
  0x30   :  { %v168_v23 = vrot.slane %v160_v21, %v506_v10  ;;  %v164_v24 = vrot.slane %v153_v22, %v506_v10  ;;  %p422_p5 = por %p421_p4, %p420_p3 }
  0x31   :  { %342 = vmatmul.mubr.msk.f32.vlgmr.msra.gmra.mrb[0].mxu0 %vm55_vm0, %v50_v7 }
  0x32   :  { %204 = vbcast.lane.b32.xlu1 %v202_v14, 256  ;;  %p423_p6 = pnand %p422_p5, %p416_p2 }
  0xa0   :  { %v198_v37 = vpop.permute.xlu1 %197 }
  0xa4   :  { %v205_v40 = vpop.permute.xlu1 %204 }
 0x104   :  { %v343_v25 = vpop.f32.mrb[0].mxu0 }
 0x105   :  { %v172_v26 = vadd.f32 %v343_v25, %v168_v23  ;;  %v128_v27 = vpop.f32.mrb[1].mxu0 }
 0x106   :  { %v171_v28 = vadd.f32 %v164_v24, %v128_v27 }
 0x107   :  { %361 = vtanh.f32 %v172_v26 }
 0x108   :  { %363 = vtanh.f32 %v171_v28 }
 0x111   :  { %v362_v30 = vpop.eup %361 }
 0x112   :  { %v364_v31 = vpop.eup %363  ;;  %v183_v34 = vmul.f32 %v362_v30, %v326_v29 }
 0x113   :  { %v182_v32 = vmul.f32 %v364_v31, %v326_v29 }
 0x114   :  { %v187_v35 = vsel %vm55_vm0, %v183_v34, 0.0 }
 0x115   :  { %v184_v33 = vsel %vm55_vm0, %v182_v32, 0.0 }
 0x116   :  { %185 = vadd.xlane.f32.xlu0 %v184_v33 }
 0x11a   :  { %188 = vadd.xlane.f32.xlu0 %v187_v35 }
 0x1a3   :  { %v186_v38 = vpop.xlane.xlu0 %185 }
 0x1a4   :  { %v208_v39 = vadd.f32 %v198_v37, %v186_v38 }
 0x1a6   :  { %213 = vperm.xlu0 %359, %v208_v39  }
 0x1a7   :  { %v189_v41 = vpop.xlane.xlu0 %188 }
 0x1a8   :  { %v209_v42 = vadd.f32 %v205_v40, %v189_v41 }
 0x1aa   :  { %216 = vperm.xlu1 %360, %v209_v42  }
 0x225   :  { %v214_v45 = vpop.permute.xlu0 %213 }
 0x226   :  { %v223_v47 = vrot.slane %v214_v45, %v222_v44 }
 0x229   :  { %v217_v46 = vpop.permute.xlu1 %216 }
 0x22a   :  { %v227_v48 = vrot.slane %v217_v46, %v222_v44 }
 0x22c   :  { %v229_v49 = vsel %vm228_vm1, %v227_v48, %v223_v47 }
 0x22d   :  { %v232_v50 = vsel %vm231_vm2, %v229_v49, -inf }
 0x22e   :  { %233 = vmax.xlane.f32.xlu1 %v232_v50 }
 0x2bb   :  { %v234_v51 = vpop.xlane.xlu1 %233 }
 0x2bc   :  { %v239_v52 = vrot.slane %v234_v51, %v506_v10  ;;  %v243_v53 = vrot.slane %v234_v51, %v511_v12 }
 0x2be   :  { %v246_v54 = vsub.f32 %v208_v39, %v239_v52  ;;  %v247_v55 = vsub.f32 %v209_v42, %v243_v53 }
 0x2c0   :  { %v248_v56 = vmul.f32 1.442695, %v246_v54  ;;  %v250_v57 = vmul.f32 1.442695, %v247_v55 }
 0x2c2   :  { %365 = vpow2.f32 %v248_v56 }
 0x2c3   :  { %367 = vpow2.f32 %v250_v57 }
 0x2cc   :  { %v366_v58 = vpop.eup %365 }
 0x2cd   :  { %v368_v59 = vpop.eup %367  ;;  %255 = vperm.xlu1 %360, %v366_v58  }
 0x2ce   :  { %258 = vperm.xlu0 %359, %v368_v59  }
 0x34c   :  { %v256_v60 = vpop.permute.xlu1 %255 }
 0x34d   :  { %v259_v61 = vpop.permute.xlu0 %258  ;;  %v263_v62 = vrot.slane %v256_v60, %v222_v44 }
 0x34e   :  { %v267_v63 = vrot.slane %v259_v61, %v222_v44 }
 0x350   :  { %v268_v0 = vsel %vm228_vm1, %v267_v63, %v263_v62 }
 0x351   :  { %v270_v1 = vsel %vm231_vm2, %v268_v0, 0.0 }
 0x352   :  { %271 = vadd.xlane.f32.xlu0 %v270_v1 }
 0x3df   :  { %v272_v2 = vpop.xlane.xlu0 %271 }
 0x3e0   :  { %369 = vlog2.f32 %v272_v2 }
 0x3ea   :  { %v370_v3 = vpop.eup %369 }
 0x3eb   :  { %v274_v4 = vmul.f32 0.6931472, %v370_v3 }
 0x3ed   :  { %v279_v5 = vrot.slane %v274_v4, %v506_v10  ;;  %v283_v6 = vrot.slane %v274_v4, %v511_v12 }
 0x3ef   :  { %v286_v7 = vsub.f32 %v246_v54, %v279_v5  ;;  %v287_v8 = vsub.f32 %v247_v55, %v283_v6 }
 0x3f1   :  { %291 = vperm.xlu1 %360, %v286_v7  }
 0x3f5   :  { %294 = vperm.xlu1 %360, %v287_v8  }
 0x470   :  { %v292_v9 = vpop.permute.xlu1 %291 }
 0x471   :  { %v299_v13 = vrot.slane %v292_v9, %v222_v44 }
 0x474   :  { %v295_v11 = vpop.permute.xlu1 %294 }
 0x475   :  { %v303_v14 = vrot.slane %v295_v11, %v222_v44 }
 0x477   :  { %v304_v15 = vsel %vm228_vm1, %v303_v14, %v299_v13 }
 0x478   :  { %306 = vst.msk [vmem:[#allocation7] sm:$0x3] %vm231_vm2, %v304_v15 }
 0x479   :  { %426 = shalt.err (!%p423_p6)
}
 0x47a   :  { %s427_s25 = scalar_lea.hbm %s552_s5, 32 }
 0x47b   :  { %p428_p7 = scmp.ne.s32.totalorder %s552_s5, %s427_s25  ;;  %p431_p8 = scmp.lt.u32.totalorder %s427_s25, %s552_s5 }
 0x47d   :  { %p433_p9 = pnand %p431_p8, %p428_p7 }
 0x47f   :  { %436 = shalt.err (!%p433_p9)
}
 0x480   :  { %316 = dma.vmem_to_hbm [thread:$0]  %s314_s4, 32, %s552_s5, [#allocation4]  }
 0x481   :  { %441 = dma.done.wait [#allocation4], 32  }
 0x482   :  { %442 = vsyncadd [#allocation4], 4294967264 }
 0x483   :  { %320 = vsyncpa [#allocation3], 1 }
 0x484   :  { %321 = vsyncpa [#allocation6], 1 }
 0x485   :  { %322 = vsyncpa [#allocation4], 1 }

// kernel: tpu_custom_call.1
= control target key start
LH: loop header
LB: loop body
LE: loop exit
PB: predicated region body
PF: predicated region fallthrough
CT: control target
= control target key end

     0   :  { %10 = vsyncpa [#allocation3], 0  ;;  %s547_s0 = inlined_call_operand.hbm [shape: f32[2,8,32], index: 0, kind: input, shape index: {}]   ;;  %s548_s1 = inlined_call_operand.vmem [shape: f32[2,32], index: 1, kind: input, shape index: {}]   ;;  %s549_s2 = inlined_call_operand.vmem [shape: f32[2,8], index: 2, kind: input, shape index: {}]   ;;  %s550_s3 = inlined_call_operand.hbm [shape: f32[32,32], index: 3, kind: input, shape index: {}]   ;;  %s551_s4 = inlined_call_operand.vmem [shape: f32[1,32], index: 4, kind: input, shape index: {}]   ;;  %s552_s5 = inlined_call_operand.hbm [shape: f32[2,8], index: 5, kind: output, shape index: {}]  }
   0x1   :  { %11 = vsyncpa [#allocation6], 0 }
   0x2   :  { %12 = vsyncpa [#allocation4], 0  ;;  %s443_s18 = smov [#allocation2]   ;;  %s371_s22 = scalar_lea.hbm %s547_s0, 256 }
   0x3   :  { %s18_s19 = sshll.u32 %s443_s18, 4  ;;  %p372_p0 = scmp.ne.s32.totalorder %s547_s0, %s371_s22  ;;  %s19_s19 = int_to_ptr.vmem [resolvable:$true] %s18_s19 }
   0x4   :  { %p375_p1 = scmp.lt.u32.totalorder %s371_s22, %s547_s0 }
   0x6   :  { %p377_p2 = pnand %p375_p1, %p372_p0 }
   0x8   :  { %380 = shalt.err (!%p377_p2)
}
   0x9   :  { %s381_s27 = scalar_lea.vmem %s19_s19, 256  ;;  %p386_p4 = scmp.lt.s32.totalorder %s19_s19, %s19_s19 }
   0xa   :  { %p382_p3 = scmp.ne.s32.totalorder %s19_s19, %s381_s27  ;;  %p387_p5 = scmp.lt.s32.totalorder %s381_s27, %s381_s27 }
   0xc   :  { %p388_p6 = por %p387_p5, %p386_p4 }
   0xe   :  { %p389_p7 = pnand %p388_p6, %p382_p3 }
  0x10   :  { %392 = shalt.err (!%p389_p7)
}
  0x11   :  { %s444_s28 = smov 128   ;;  %s445_s29 = smov 8  }
  0x12   :  { %24 = dma.hbm_to_vmem [thread:$0]  %s547_s0, 256, %s19_s19, [#allocation3], %s444_s28, %s444_s28, %s445_s29  }
  0x13   :  { %s446_s7 = smov [#allocation5]   ;;  %s393_s11 = scalar_lea.hbm %s550_s3, 512 }
  0x14   :  { %s34_s8 = sshll.u32 %s446_s7, 4  ;;  %p394_p8 = scmp.ne.s32.totalorder %s550_s3, %s393_s11  ;;  %s35_s8 = int_to_ptr.vmem [resolvable:$true] %s34_s8 }
  0x15   :  { %p397_p9 = scmp.lt.u32.totalorder %s393_s11, %s550_s3 }
  0x17   :  { %p399_p10 = pnand %p397_p9, %p394_p8 }
  0x19   :  { %402 = shalt.err (!%p399_p10)
}
  0x1a   :  { %s403_s16 = scalar_lea.vmem %s35_s8, 512  ;;  %p408_p12 = scmp.lt.s32.totalorder %s35_s8, %s35_s8 }
  0x1b   :  { %p404_p11 = scmp.ne.s32.totalorder %s35_s8, %s403_s16  ;;  %p409_p13 = scmp.lt.s32.totalorder %s403_s16, %s403_s16 }
  0x1d   :  { %p410_p0 = por %p409_p13, %p408_p12 }
  0x1f   :  { %p411_p1 = pnand %p410_p0, %p404_p11 }
  0x21   :  { %414 = shalt.err (!%p411_p1)
}
  0x22   :  { %40 = dma.hbm_to_vmem [thread:$0]  %s550_s3, 512, %s35_s8, [#allocation6], %s444_s28, %s444_s28, %s445_s29  }
  0x23   :  { %437 = dma.done.wait [#allocation3], 256  }
  0x24   :  { %438 = vsyncadd [#allocation3], 4294967040 }
  0x25   :  { %439 = dma.done.wait [#allocation6], 512  }
  0x26   :  { %440 = vsyncadd [#allocation6], 4294966784  ;;  %vm55_vm0 = vcmask 261120   ;;  %v51_v0 = vld [vmem:[#allocation5] sm:$0xff]  ;;  %v52_v1 = vld [vmem:[#allocation5 + $0x8] sm:$0xff]  ;;  %v150_v8 = vlaneseq  ;;  %v448_v36 = vmov 0  }
  0x27   :  { %v53_v2 = vld [vmem:[#allocation5 + $0x10] sm:$0xff]  ;;  %v344_v3 = vpack.c.bf16 %v52_v1, %v51_v0  ;;  %v54_v4 = vld [vmem:[#allocation5 + $0x18] sm:$0xff]  ;;  %v447_v15 = vmov 1966171168   ;;  %359 = vset.pattern.permute.xlu0 %v448_v36  ;;  %360 = vset.pattern.permute.xlu1 %v448_v36  ;;  %vm228_vm1 = vcmask 1041409   ;;  %vm231_vm2 = vcmask 58368  }
  0x28   :  { %v49_v5 = vld [vmem:[#allocation2] sm:$0xff]  ;;  %v348_v6 = vpack.c.bf16 %v54_v4, %v53_v2  ;;  %v50_v7 = vld [vmem:[#allocation2 + $0x8] sm:$0xff]  ;;  %v151_v9 = vshrl.u32 %v150_v8, 7  ;;  %v148_v16 = vunpack.c.l.s4 %v447_v15  ;;  %v219_v43 = vand.u32 127, %v150_v8 }
  0x29   :  { %341 = vmatprep.mubr.msk.f32.mxu0 %vm55_vm0, %v49_v5  ;;  %345 = vmatprep.subr.bf16.mxu0 %v344_v3  ;;  %v190_v11 = vld [vmem:[%s549_s2] sm:$0x3] }
  0x2a   :  { %347 = vmatpush3.bf16.msra.mxu0 %v344_v3  ;;  %v506_v10 = vsub.s32 0, %v151_v9  ;;  %v511_v12 = vsub.s32 1, %v151_v9  ;;  %v149_v17 = vunpack.c.0.s8 %v148_v16  ;;  %v325_v18 = vld.sshfl [vmem:[%s548_s1] sm:$0x11 pattern:$0x75316420]  ;;  %v222_v44 = vsub.s32 %v219_v43, %v151_v9 }
  0x2b   :  { %349 = vmatprep.subr.bf16.mxu0 %v348_v6  ;;  %v146_v19 = vcombine.high %v325_v18, %v325_v18  ;;  %v326_v29 = vld [vmem:[%s551_s4] ss:$0 sm:$0xff]  ;;  %s449_s1 = smov [#allocation7]  }
  0x2c   :  { %v195_v13 = vrot.slane %v190_v11, %v506_v10  ;;  %v202_v14 = vrot.slane %v190_v11, %v511_v12  ;;  %v152_v20 = vsub.s32 %v149_v17, %v151_v9  ;;  %s313_s4 = sshll.u32 %s449_s1, 4  ;;  %s314_s4 = int_to_ptr.vmem [resolvable:$true] %s313_s4 }
  0x2d   :  { %s415_s22 = scalar_lea.vmem %s314_s4, 32  ;;  %p420_p3 = scmp.lt.s32.totalorder %s314_s4, %s314_s4 }
  0x2e   :  { %351 = vmatpush3.bf16.msra.mxu0 %v348_v6  ;;  %197 = vbcast.lane.b32.xlu1 %v195_v13, 256  ;;  %v160_v21 = vrot.slane %v146_v19, %v152_v20  ;;  %v153_v22 = vrot.slane %v325_v18, %v152_v20  ;;  %p416_p2 = scmp.ne.s32.totalorder %s314_s4, %s415_s22  ;;  %p421_p4 = scmp.lt.s32.totalorder %s415_s22, %s415_s22 }
  0x30   :  { %v168_v23 = vrot.slane %v160_v21, %v506_v10  ;;  %v164_v24 = vrot.slane %v153_v22, %v506_v10  ;;  %p422_p5 = por %p421_p4, %p420_p3 }
  0x31   :  { %342 = vmatmul.mubr.msk.f32.vlgmr.msra.gmra.mrb[0].mxu0 %vm55_vm0, %v50_v7 }
  0x32   :  { %204 = vbcast.lane.b32.xlu1 %v202_v14, 256  ;;  %p423_p6 = pnand %p422_p5, %p416_p2 }
  0xa0   :  { %v198_v37 = vpop.permute.xlu1 %197 }
  0xa4   :  { %v205_v40 = vpop.permute.xlu1 %204 }
 0x104   :  { %v343_v25 = vpop.f32.mrb[0].mxu0 }
 0x105   :  { %v172_v26 = vadd.f32 %v343_v25, %v168_v23  ;;  %v128_v27 = vpop.f32.mrb[1].mxu0 }
 0x106   :  { %v171_v28 = vadd.f32 %v164_v24, %v128_v27 }
 0x107   :  { %361 = vtanh.f32 %v172_v26 }
 0x108   :  { %363 = vtanh.f32 %v171_v28 }
 0x111   :  { %v362_v30 = vpop.eup %361 }
 0x112   :  { %v364_v31 = vpop.eup %363  ;;  %v183_v34 = vmul.f32 %v362_v30, %v326_v29 }
 0x113   :  { %v182_v32 = vmul.f32 %v364_v31, %v326_v29 }
 0x114   :  { %v187_v35 = vsel %vm55_vm0, %v183_v34, 0.0 }
 0x115   :  { %v184_v33 = vsel %vm55_vm0, %v182_v32, 0.0 }
 0x116   :  { %185 = vadd.xlane.f32.xlu0 %v184_v33 }
 0x11a   :  { %188 = vadd.xlane.f32.xlu0 %v187_v35 }
 0x1a3   :  { %v186_v38 = vpop.xlane.xlu0 %185 }
 0x1a4   :  { %v208_v39 = vadd.f32 %v198_v37, %v186_v38 }
 0x1a6   :  { %213 = vperm.xlu0 %359, %v208_v39  }
 0x1a7   :  { %v189_v41 = vpop.xlane.xlu0 %188 }
 0x1a8   :  { %v209_v42 = vadd.f32 %v205_v40, %v189_v41 }
 0x1aa   :  { %216 = vperm.xlu1 %360, %v209_v42  }
 0x225   :  { %v214_v45 = vpop.permute.xlu0 %213 }
 0x226   :  { %v223_v47 = vrot.slane %v214_v45, %v222_v44 }
 0x229   :  { %v217_v46 = vpop.permute.xlu1 %216 }
 0x22a   :  { %v227_v48 = vrot.slane %v217_v46, %v222_v44 }
 0x22c   :  { %v229_v49 = vsel %vm228_vm1, %v227_v48, %v223_v47 }
 0x22d   :  { %v232_v50 = vsel %vm231_vm2, %v229_v49, -inf }
 0x22e   :  { %233 = vmax.xlane.f32.xlu1 %v232_v50 }
 0x2bb   :  { %v234_v51 = vpop.xlane.xlu1 %233 }
 0x2bc   :  { %v239_v52 = vrot.slane %v234_v51, %v506_v10  ;;  %v243_v53 = vrot.slane %v234_v51, %v511_v12 }
 0x2be   :  { %v246_v54 = vsub.f32 %v208_v39, %v239_v52  ;;  %v247_v55 = vsub.f32 %v209_v42, %v243_v53 }
 0x2c0   :  { %v248_v56 = vmul.f32 1.442695, %v246_v54  ;;  %v250_v57 = vmul.f32 1.442695, %v247_v55 }
 0x2c2   :  { %365 = vpow2.f32 %v248_v56 }
 0x2c3   :  { %367 = vpow2.f32 %v250_v57 }
 0x2cc   :  { %v366_v58 = vpop.eup %365 }
 0x2cd   :  { %v368_v59 = vpop.eup %367  ;;  %255 = vperm.xlu1 %360, %v366_v58  }
 0x2ce   :  { %258 = vperm.xlu0 %359, %v368_v59  }
 0x34c   :  { %v256_v60 = vpop.permute.xlu1 %255 }
 0x34d   :  { %v259_v61 = vpop.permute.xlu0 %258  ;;  %v263_v62 = vrot.slane %v256_v60, %v222_v44 }
 0x34e   :  { %v267_v63 = vrot.slane %v259_v61, %v222_v44 }
 0x350   :  { %v268_v0 = vsel %vm228_vm1, %v267_v63, %v263_v62 }
 0x351   :  { %v270_v1 = vsel %vm231_vm2, %v268_v0, 0.0 }
 0x352   :  { %271 = vadd.xlane.f32.xlu0 %v270_v1 }
 0x3df   :  { %v272_v2 = vpop.xlane.xlu0 %271 }
 0x3e0   :  { %369 = vlog2.f32 %v272_v2 }
 0x3ea   :  { %v370_v3 = vpop.eup %369 }
 0x3eb   :  { %v274_v4 = vmul.f32 0.6931472, %v370_v3 }
 0x3ed   :  { %v279_v5 = vrot.slane %v274_v4, %v506_v10  ;;  %v283_v6 = vrot.slane %v274_v4, %v511_v12 }
 0x3ef   :  { %v286_v7 = vsub.f32 %v246_v54, %v279_v5  ;;  %v287_v8 = vsub.f32 %v247_v55, %v283_v6 }
 0x3f1   :  { %291 = vperm.xlu1 %360, %v286_v7  }
 0x3f5   :  { %294 = vperm.xlu1 %360, %v287_v8  }
 0x470   :  { %v292_v9 = vpop.permute.xlu1 %291 }
 0x471   :  { %v299_v13 = vrot.slane %v292_v9, %v222_v44 }
 0x474   :  { %v295_v11 = vpop.permute.xlu1 %294 }
 0x475   :  { %v303_v14 = vrot.slane %v295_v11, %v222_v44 }
 0x477   :  { %v304_v15 = vsel %vm228_vm1, %v303_v14, %v299_v13 }
 0x478   :  { %306 = vst.msk [vmem:[#allocation7] sm:$0x3] %vm231_vm2, %v304_v15 }
 0x479   :  { %426 = shalt.err (!%p423_p6)
}
 0x47a   :  { %s427_s25 = scalar_lea.hbm %s552_s5, 32 }
 0x47b   :  { %p428_p7 = scmp.ne.s32.totalorder %s552_s5, %s427_s25  ;;  %p431_p8 = scmp.lt.u32.totalorder %s427_s25, %s552_s5 }
 0x47d   :  { %p433_p9 = pnand %p431_p8, %p428_p7 }
 0x47f   :  { %436 = shalt.err (!%p433_p9)
}
 0x480   :  { %316 = dma.vmem_to_hbm [thread:$0]  %s314_s4, 32, %s552_s5, [#allocation4]  }
 0x481   :  { %441 = dma.done.wait [#allocation4], 32  }
 0x482   :  { %442 = vsyncadd [#allocation4], 4294967264 }
 0x483   :  { %320 = vsyncpa [#allocation3], 1 }
 0x484   :  { %321 = vsyncpa [#allocation6], 1 }
 0x485   :  { %322 = vsyncpa [#allocation4], 1 }

</bundles_post_ra>
